<compile_context>
chip_gen: v6e
topology: v6e:2x2x1
jax: 0.10.0
libtpu: 0.0.40
codegen_flags: <defaults>
</compile_context>

<pallas_src>
import functools

import jax
import jax.numpy as jnp
from jax.experimental import pallas as pl
from jax.experimental.pallas import tpu as pltpu


def _round_up(x, m):
    return (x + m - 1) // m * m


# ----------------------------------------------------------------------------
# Pallas kernels: tiled matmul with fused (scale * acc + shift) [+ ReLU]
# ----------------------------------------------------------------------------
def _mm_kernel_single_k(x_ref, w_ref, s_ref, b_ref, o_ref, *, relu):
    """Whole K in one block: no scratch, no init/finalize phases."""
    acc = jnp.dot(x_ref[...], w_ref[...], preferred_element_type=jnp.float32)
    y = acc * s_ref[...] + b_ref[...]          # f32 epilogue (v5e-safe)
    if relu:
        y = jnp.maximum(y, 0.0)
    o_ref[...] = y.astype(o_ref.dtype)


def _mm_kernel_acc(x_ref, w_ref, s_ref, b_ref, o_ref, acc_ref, *, relu):
    """K-tiled path with an f32 VMEM accumulator (grid = (m, n, k), k innermost)."""
    k = pl.program_id(2)

    @pl.when(k == 0)
    def _():
        acc_ref[...] = jnp.zeros_like(acc_ref)

    acc_ref[...] += jnp.dot(x_ref[...], w_ref[...],
                            preferred_element_type=jnp.float32)

    @pl.when(k == pl.num_programs(2) - 1)
    def _():
        y = acc_ref[...] * s_ref[...] + b_ref[...]
        if relu:
            y = jnp.maximum(y, 0.0)
        o_ref[...] = y.astype(o_ref.dtype)


def _pick_tile_m(M):
    """Prefer a tile (<=1024, >=8) that divides M so no M padding is needed."""
    for tm in (1024, 512, 256, 128, 64, 32, 16, 8):
        if M % tm == 0:
            return tm, M
    tm = 256
    return tm, _round_up(M, tm)


def _pick_tile_k(Kp):
    """Kp is a multiple of 128.  Prefer multiples of 256 for the v6e/v7x MXU."""
    if Kp <= 2048:
        return Kp                       # single-K fast path
    for tk in (1024, 512, 256):
        if Kp % tk == 0:
            return tk
    for tk in (896, 768, 640, 384, 128):
        if Kp % tk == 0:
            return tk
    return 128


# Explicit scoped-VMEM limit: well above what the small tiles need, with
# headroom under v7x's 64 MiB physical VMEM (128 MiB on v5e/v6e).
_VMEM_LIMIT_BYTES = 48 * 1024 * 1024


def matmul_scale_shift(x2d, w2d, scale, shift, *, relu, out_dtype, n_out):
    """maybe_relu((x2d @ w2d) * scale + shift) as one fused Pallas call.

    x2d:   (M, K)  bfloat16 activations (im2col / flattened pixels).
    w2d:   (Kp, Np) bfloat16, pre-padded to lane multiples at init time.
    scale, shift: (1, Np) float32, pre-padded at init time.
    n_out: static Python int (unpadded output channels).
    Returns (M, n_out) in out_dtype.
    """
    M, K = x2d.shape
    Kp, Np = w2d.shape
    assert isinstance(n_out, int), "n_out must be a static Python int"
    assert Kp >= K and Kp % 128 == 0 and Np % 128 == 0

    tm, Mp = _pick_tile_m(M)
    tn = 256 if Np % 256 == 0 else 128
    tk = _pick_tile_k(Kp)

    # Only activations are padded at runtime (K to the pre-padded weight K,
    # M only if no divisor tile was found).
    xp = x2d
    if Mp != M or Kp != K:
        xp = jnp.pad(x2d, ((0, Mp - M), (0, Kp - K)))

    if tk == Kp:
        # --- single-K: no accumulator scratch, 2-D grid, both axes parallel ---
        grid = (Mp // tm, Np // tn)
        out = pl.pallas_call(
            functools.partial(_mm_kernel_single_k, relu=relu),
            out_shape=jax.ShapeDtypeStruct((Mp, Np), out_dtype),
            grid_spec=pltpu.PrefetchScalarGridSpec(
                num_scalar_prefetch=0,
                grid=grid,
                in_specs=[
                    pl.BlockSpec((tm, Kp), lambda i, j: (i, 0)),
                    pl.BlockSpec((Kp, tn), lambda i, j: (0, j)),
                    pl.BlockSpec((1, tn), lambda i, j: (0, j)),
                    pl.BlockSpec((1, tn), lambda i, j: (0, j)),
                ],
                out_specs=pl.BlockSpec((tm, tn), lambda i, j: (i, j)),
            ),
            compiler_params=pltpu.CompilerParams(
                dimension_semantics=("parallel", "parallel"),
                vmem_limit_bytes=_VMEM_LIMIT_BYTES),
        )(xp, w2d, scale, shift)
    else:
        # --- K-tiled: grid (m, n, k), K innermost + "arbitrary", f32 scratch ---
        # x is re-fetched Np/tn times per M tile; tn<=256 keeps that small.
        grid = (Mp // tm, Np // tn, Kp // tk)
        out = pl.pallas_call(
            functools.partial(_mm_kernel_acc, relu=relu),
            out_shape=jax.ShapeDtypeStruct((Mp, Np), out_dtype),
            grid_spec=pltpu.PrefetchScalarGridSpec(
                num_scalar_prefetch=0,
                grid=grid,
                in_specs=[
                    pl.BlockSpec((tm, tk), lambda i, j, k: (i, k)),
                    pl.BlockSpec((tk, tn), lambda i, j, k: (k, j)),
                    pl.BlockSpec((1, tn), lambda i, j, k: (0, j)),
                    pl.BlockSpec((1, tn), lambda i, j, k: (0, j)),
                ],
                out_specs=pl.BlockSpec((tm, tn), lambda i, j, k: (i, j)),
                scratch_shapes=[pltpu.VMEM((tm, tn), jnp.float32)],
            ),
            compiler_params=pltpu.CompilerParams(
                dimension_semantics=("parallel", "parallel", "arbitrary"),
                vmem_limit_bytes=_VMEM_LIMIT_BYTES),
        )(xp, w2d, scale, shift)

    # Static slice: M and n_out are Python ints.
    return out[:M, :n_out]


# ----------------------------------------------------------------------------
# Layer wrappers
# ----------------------------------------------------------------------------
def conv3x3_bn_relu(x, p, *, cout, out_dtype):
    """3x3 conv (padding=1) + folded BatchNorm + ReLU, NHWC in/out.

    `cout` is a static Python int (not part of the traced params pytree).
    """
    N, H, W, C = x.shape
    xb = x.astype(jnp.bfloat16)                         # bf16 operands for the MXU
    xp = jnp.pad(xb, ((0, 0), (1, 1), (1, 1), (0, 0)))
    # TODO(synk): im2col still materializes 9x the activation bytes (in bf16);
    # a direct-conv kernel with halo DMAs over row blocks would remove it.
    cols = jnp.concatenate(
        [xp[:, dy:dy + H, dx:dx + W, :] for dy in range(3) for dx in range(3)],
        axis=-1)                                        # (N, H, W, 9*C) bf16
    x2d = cols.reshape(N * H * W, 9 * C)
    y = matmul_scale_shift(x2d, p["w2d"], p["scale"], p["shift"],
                           relu=True, out_dtype=out_dtype, n_out=cout)
    return y.reshape(N, H, W, cout)


def maxpool2x2(x):
    # TODO(synk): fusing the 2x2 max-pool into the first conv's input gather
    # would save one HBM pass; kept as XLA-fused glue (it fuses with the pad +
    # im2col gather feeding the first Pallas matmul).
    N, H, W, C = x.shape
    return x.reshape(N, H // 2, 2, W // 2, 2, C).max(axis=(2, 4))


# ----------------------------------------------------------------------------
# Parameter init (deterministic; BatchNorm running stats folded -> scale/shift;
# weights pre-reshaped / pre-padded / pre-cast so the forward pass does no
# per-call weight transforms).  Returns (pallas_params, reference_params);
# only pallas_params is passed through jit.
# ----------------------------------------------------------------------------
def _conv_bn_params(key, cin, cout):
    kw, kb, kg, kbe, km, kv = jax.random.split(key, 6)
    fan_in = 9 * cin
    w = jax.random.normal(kw, (3, 3, cin, cout), jnp.float32) * jnp.sqrt(2.0 / fan_in)
    b = 0.01 * jax.random.normal(kb, (cout,), jnp.float32)
    gamma = 1.0 + 0.1 * jax.random.normal(kg, (cout,), jnp.float32)
    beta = 0.05 * jax.random.normal(kbe, (cout,), jnp.float32)
    rmean = 0.02 * jax.random.normal(km, (cout,), jnp.float32)
    rvar = 1.0 + 0.1 * jnp.abs(jax.random.normal(kv, (cout,), jnp.float32))
    eps = 1e-5
    scale = gamma / jnp.sqrt(rvar + eps)                 # BN fold (inference mode)
    shift = (b - rmean) * scale + beta

    K = 9 * cin
    Kp = _round_up(K, 128)
    Np = _round_up(cout, 128)
    w2d = jnp.pad(w.reshape(K, cout), ((0, Kp - K), (0, Np - cout))).astype(jnp.bfloat16)
    scale_p = jnp.pad(scale, (0, Np - cout)).reshape(1, Np)
    shift_p = jnp.pad(shift, (0, Np - cout)).reshape(1, Np)
    pallas_p = {"w2d": w2d, "scale": scale_p, "shift": shift_p}
    # f32 copies kept only for the pure-JAX reference check (not jitted).
    ref_p = {"w_hwio": w, "scale_v": scale, "shift_v": shift}
    return pallas_p, ref_p


def init_downsample_params(key, in_c, out_c):
    k1, k2 = jax.random.split(key)
    p1, r1 = _conv_bn_params(k1, in_c, out_c)
    p2, r2 = _conv_bn_params(k2, out_c, out_c)
    return {"conv1": p1, "conv2": p2}, {"conv1": r1, "conv2": r2}


# ----------------------------------------------------------------------------
# DownSample forward (matches the PyTorch module: NCHW in, NCHW out).
# `out_c` is static (bake with functools.partial before jit).
# ----------------------------------------------------------------------------
def downsample_forward(params, x_nchw, *, out_c):
    x = jnp.transpose(x_nchw, (0, 2, 3, 1))              # NCHW -> NHWC
    x = maxpool2x2(x)
    # Intermediate activation kept in bf16 (feeds the next bf16 matmul anyway);
    # final output in f32 to match the module's dtype.
    x = conv3x3_bn_relu(x, params["conv1"], cout=out_c, out_dtype=jnp.bfloat16)
    x = conv3x3_bn_relu(x, params["conv2"], cout=out_c, out_dtype=jnp.float32)
    return jnp.transpose(x, (0, 3, 1, 2))                # NHWC -> NCHW


# Pure-JAX f32 reference (for a loose-tolerance correctness check vs bf16 MXU).
def downsample_reference(ref_params, x_nchw):
    x = jnp.transpose(x_nchw, (0, 2, 3, 1))
    x = maxpool2x2(x)
    for name in ("conv1", "conv2"):
        p = ref_params[name]
        x = jax.lax.conv_general_dilated(
            x, p["w_hwio"], window_strides=(1, 1), padding="SAME",
            dimension_numbers=("NHWC", "HWIO", "NHWC"))
        x = jnp.maximum(x * p["scale_v"] + p["shift_v"], 0.0)
    return jnp.transpose(x, (0, 3, 1, 2))


if __name__ == "__main__":
    key = jax.random.PRNGKey(0)
    kp, kx = jax.random.split(key)
    in_c, out_c = 4, 8
    params, ref_params = init_downsample_params(kp, in_c, out_c)
    x = jax.random.normal(kx, (2, in_c, 16, 16), jnp.float32)   # NCHW, like PyTorch

    fwd = jax.jit(functools.partial(downsample_forward, out_c=out_c))
    out = jax.block_until_ready(fwd(params, x))

    assert out.shape == (2, out_c, 8, 8), out.shape
    assert bool(jnp.all(jnp.isfinite(out)))

    ref = downsample_reference(ref_params, x)
    max_err = float(jnp.max(jnp.abs(out.astype(jnp.float32) - ref)))
    assert max_err < 0.15, f"max abs err vs f32 reference: {max_err}"

    print("KERNEL_OK")
</pallas_src>

<mosaic_0001>
module attributes {stable_mosaic.version = 11 : i64} {
  func.func @_mm_kernel_single_k(%arg0: i32, %arg1: i32, %arg2: memref<128x128xbf16, #tpu.memory_space<vmem>>, %arg3: memref<128x128xbf16, #tpu.memory_space<vmem>>, %arg4: memref<1x128xf32, #tpu.memory_space<vmem>>, %arg5: memref<1x128xf32, #tpu.memory_space<vmem>>, %arg6: memref<128x128xbf16, #tpu.memory_space<vmem>>) attributes {dimension_semantics = [#tpu.dimension_semantics<parallel>, #tpu.dimension_semantics<parallel>], iteration_bounds = array<i64: 1, 1>, scalar_prefetch = 0 : i64, scratch_operands = 0 : i64, tpu.core_type = #tpu.core_type<tc>, window_params = [{transform_indices = @transform_0, window_bounds = array<i64: 128, 128>}, {transform_indices = @transform_1, window_bounds = array<i64: 128, 128>}, {transform_indices = @transform_2, window_bounds = array<i64: 1, 128>}, {transform_indices = @transform_3, window_bounds = array<i64: 1, 128>}, {transform_indices = @transform_4, window_bounds = array<i64: 128, 128>}]} {
    %c0 = arith.constant 0 : index
    %c0_0 = arith.constant 0 : index
    %0 = vector.load %arg2[%c0, %c0_0] : memref<128x128xbf16, #tpu.memory_space<vmem>>, vector<128x128xbf16>
    %c0_1 = arith.constant 0 : index
    %c0_2 = arith.constant 0 : index
    %1 = vector.load %arg3[%c0_1, %c0_2] : memref<128x128xbf16, #tpu.memory_space<vmem>>, vector<128x128xbf16>
    %cst = arith.constant dense<0.000000e+00> : vector<128x128xf32>
    %2 = tpu.matmul %0, %1, %cst {dimension_numbers = #tpu.dot_dimension_numbers<[1], [0], [0], [1], [0, 0, 1, 1], [], []>} : vector<128x128xbf16>, vector<128x128xbf16>, vector<128x128xf32> -> vector<128x128xf32>
    %c0_3 = arith.constant 0 : index
    %c0_4 = arith.constant 0 : index
    %3 = vector.load %arg4[%c0_3, %c0_4] : memref<1x128xf32, #tpu.memory_space<vmem>>, vector<1x128xf32>
    %4 = vector.broadcast %3 : vector<1x128xf32> to vector<128x128xf32>
    %5 = arith.mulf %2, %4 : vector<128x128xf32>
    %c0_5 = arith.constant 0 : index
    %c0_6 = arith.constant 0 : index
    %6 = vector.load %arg5[%c0_5, %c0_6] : memref<1x128xf32, #tpu.memory_space<vmem>>, vector<1x128xf32>
    %7 = vector.broadcast %6 : vector<1x128xf32> to vector<128x128xf32>
    %8 = arith.addf %5, %7 : vector<128x128xf32>
    %cst_7 = arith.constant 0.000000e+00 : f32
    %9 = vector.broadcast %cst_7 : f32 to vector<128x128xf32>
    %10 = arith.maximumf %8, %9 : vector<128x128xf32>
    %11 = arith.truncf %10 : vector<128x128xf32> to vector<128x128xbf16>
    %c0_8 = arith.constant 0 : index
    %c0_9 = arith.constant 0 : index
    %12 = vector.load %arg6[%c0_8, %c0_9] : memref<128x128xbf16, #tpu.memory_space<vmem>>, vector<128x128xbf16>
    tpu.vector_store %arg6[%c0_8, %c0_9], %11 {strides = array<i32>} : memref<128x128xbf16, #tpu.memory_space<vmem>>, vector<128x128xbf16>,
    return
  }
  func.func @transform_0(%arg0: i32, %arg1: i32) -> (i32, i32) {
    %c0_i32 = arith.constant 0 : i32
    %c0_i32_0 = arith.constant 0 : i32
    return %arg0, %c0_i32 : i32, i32
  }
  func.func @transform_1(%arg0: i32, %arg1: i32) -> (i32, i32) {
    %c0_i32 = arith.constant 0 : i32
    %c0_i32_0 = arith.constant 0 : i32
    return %c0_i32, %arg1 : i32, i32
  }
  func.func @transform_2(%arg0: i32, %arg1: i32) -> (i32, i32) {
    %c0_i32 = arith.constant 0 : i32
    %c0_i32_0 = arith.constant 0 : i32
    return %c0_i32, %arg1 : i32, i32
  }
  func.func @transform_3(%arg0: i32, %arg1: i32) -> (i32, i32) {
    %c0_i32 = arith.constant 0 : i32
    %c0_i32_0 = arith.constant 0 : i32
    return %c0_i32, %arg1 : i32, i32
  }
  func.func @transform_4(%arg0: i32, %arg1: i32) -> (i32, i32) {
    %c0_i32 = arith.constant 0 : i32
    return %arg0, %arg1 : i32, i32
  }
}

module attributes {stable_mosaic.version = 11 : i64} {
  func.func @_mm_kernel_single_k(%arg0: i32, %arg1: i32, %arg2: memref<128x128xbf16, #tpu.memory_space<vmem>>, %arg3: memref<128x128xbf16, #tpu.memory_space<vmem>>, %arg4: memref<1x128xf32, #tpu.memory_space<vmem>>, %arg5: memref<1x128xf32, #tpu.memory_space<vmem>>, %arg6: memref<128x128xf32, #tpu.memory_space<vmem>>) attributes {dimension_semantics = [#tpu.dimension_semantics<parallel>, #tpu.dimension_semantics<parallel>], iteration_bounds = array<i64: 1, 1>, scalar_prefetch = 0 : i64, scratch_operands = 0 : i64, tpu.core_type = #tpu.core_type<tc>, window_params = [{transform_indices = @transform_0, window_bounds = array<i64: 128, 128>}, {transform_indices = @transform_1, window_bounds = array<i64: 128, 128>}, {transform_indices = @transform_2, window_bounds = array<i64: 1, 128>}, {transform_indices = @transform_3, window_bounds = array<i64: 1, 128>}, {transform_indices = @transform_4, window_bounds = array<i64: 128, 128>}]} {
    %c0 = arith.constant 0 : index
    %c0_0 = arith.constant 0 : index
    %0 = vector.load %arg2[%c0, %c0_0] : memref<128x128xbf16, #tpu.memory_space<vmem>>, vector<128x128xbf16>
    %c0_1 = arith.constant 0 : index
    %c0_2 = arith.constant 0 : index
    %1 = vector.load %arg3[%c0_1, %c0_2] : memref<128x128xbf16, #tpu.memory_space<vmem>>, vector<128x128xbf16>
    %cst = arith.constant dense<0.000000e+00> : vector<128x128xf32>
    %2 = tpu.matmul %0, %1, %cst {dimension_numbers = #tpu.dot_dimension_numbers<[1], [0], [0], [1], [0, 0, 1, 1], [], []>} : vector<128x128xbf16>, vector<128x128xbf16>, vector<128x128xf32> -> vector<128x128xf32>
    %c0_3 = arith.constant 0 : index
    %c0_4 = arith.constant 0 : index
    %3 = vector.load %arg4[%c0_3, %c0_4] : memref<1x128xf32, #tpu.memory_space<vmem>>, vector<1x128xf32>
    %4 = vector.broadcast %3 : vector<1x128xf32> to vector<128x128xf32>
    %5 = arith.mulf %2, %4 : vector<128x128xf32>
    %c0_5 = arith.constant 0 : index
    %c0_6 = arith.constant 0 : index
    %6 = vector.load %arg5[%c0_5, %c0_6] : memref<1x128xf32, #tpu.memory_space<vmem>>, vector<1x128xf32>
    %7 = vector.broadcast %6 : vector<1x128xf32> to vector<128x128xf32>
    %8 = arith.addf %5, %7 : vector<128x128xf32>
    %cst_7 = arith.constant 0.000000e+00 : f32
    %9 = vector.broadcast %cst_7 : f32 to vector<128x128xf32>
    %10 = arith.maximumf %8, %9 : vector<128x128xf32>
    %c0_8 = arith.constant 0 : index
    %c0_9 = arith.constant 0 : index
    %11 = vector.load %arg6[%c0_8, %c0_9] : memref<128x128xf32, #tpu.memory_space<vmem>>, vector<128x128xf32>
    tpu.vector_store %arg6[%c0_8, %c0_9], %10 {strides = array<i32>} : memref<128x128xf32, #tpu.memory_space<vmem>>, vector<128x128xf32>,
    return
  }
  func.func @transform_0(%arg0: i32, %arg1: i32) -> (i32, i32) {
    %c0_i32 = arith.constant 0 : i32
    %c0_i32_0 = arith.constant 0 : i32
    return %arg0, %c0_i32 : i32, i32
  }
  func.func @transform_1(%arg0: i32, %arg1: i32) -> (i32, i32) {
    %c0_i32 = arith.constant 0 : i32
    %c0_i32_0 = arith.constant 0 : i32
    return %c0_i32, %arg1 : i32, i32
  }
  func.func @transform_2(%arg0: i32, %arg1: i32) -> (i32, i32) {
    %c0_i32 = arith.constant 0 : i32
    %c0_i32_0 = arith.constant 0 : i32
    return %c0_i32, %arg1 : i32, i32
  }
  func.func @transform_3(%arg0: i32, %arg1: i32) -> (i32, i32) {
    %c0_i32 = arith.constant 0 : i32
    %c0_i32_0 = arith.constant 0 : i32
    return %c0_i32, %arg1 : i32, i32
  }
  func.func @transform_4(%arg0: i32, %arg1: i32) -> (i32, i32) {
    %c0_i32 = arith.constant 0 : i32
    return %arg0, %arg1 : i32, i32
  }
}

</mosaic_0001>

<bundles_post_ra>
// kernel: downsample_forward.2
= control target key start
LH: loop header
LB: loop body
LE: loop exit
PB: predicated region body
PF: predicated region fallthrough
CT: control target
= control target key end

     0   :  { %s687_s1 = inlined_call_operand.vmem [shape: bf16[128,128], index: 1, kind: input, shape index: {}]   ;;  %s688_s0 = inlined_call_operand.vmem [shape: bf16[128,128], index: 0, kind: input, shape index: {}]   ;;  %s689_s2 = inlined_call_operand.vmem [shape: f32[1,128], index: 2, kind: input, shape index: {}]   ;;  %s690_s3 = inlined_call_operand.vmem [shape: f32[1,128], index: 3, kind: input, shape index: {}]   ;;  %s691_s4 = inlined_call_operand.vmem [shape: bf16[128,128], index: 4, kind: output, shape index: {}]  }
   0x1   :  { %v550_v0 = vld [vmem:[%s687_s1 + $0x38] sm:$0xff]   ;;  %v551_v1 = vld [vmem:[%s687_s1 + $0x30] sm:$0xff]   ;;  %v552_v2 = vld [vmem:[%s687_s1 + $0x28] sm:$0xff]  }
   0x2   :  { %502 = vmatprep.subr.bf16.mxu0 %v550_v0  ;;  %534 = vmatprep.subr.bf16.mxu1 %v550_v0  ;;  %v553_v3 = vld [vmem:[%s687_s1 + $0x20] sm:$0xff]   ;;  %v554_v6 = vld [vmem:[%s687_s1 + $0x18] sm:$0xff]   ;;  %v555_v7 = vld [vmem:[%s687_s1 + $0x10] sm:$0xff]  }
   0x3   :  { %503 = vmatpush3.bf16.msra.mxu0 %v550_v0  ;;  %542 = vmatpush3.bf16.msra.mxu1 %v550_v0  ;;  %v558_v4 = vld [vmem:[%s688_s0] sm:$0xff]   ;;  %v556_v8 = vld [vmem:[%s687_s1 + $0x8] sm:$0xff]   ;;  %v562_v12 = vld [vmem:[%s688_s0 + $0x10] sm:$0xff]  }
   0x4   :  { %504 = vmatprep.subr.bf16.mxu0 %v551_v1  ;;  %535 = vmatprep.subr.bf16.mxu1 %v551_v1  ;;  %v559_v5 = vld [vmem:[%s688_s0 + $0x20] sm:$0xff]   ;;  %v560_v10 = vld [vmem:[%s688_s0 + $0x8] sm:$0xff]   ;;  %v563_v13 = vld [vmem:[%s688_s0 + $0x30] sm:$0xff]  }
   0x5   :  { %518 = vmatprep.mubr.bf16.mxu0 %v558_v4  ;;  %526 = vmatprep.mubr.bf16.mxu1 %v559_v5  ;;  %v557_v9 = vld [vmem:[%s687_s1] sm:$0xff]   ;;  %v561_v11 = vld [vmem:[%s688_s0 + $0x28] sm:$0xff]   ;;  %v564_v14 = vld [vmem:[%s688_s0 + $0x18] sm:$0xff]  }
   0x6   :  { %v565_v15 = vld [vmem:[%s688_s0 + $0x38] sm:$0xff]   ;;  %v642_v16 = vld [vmem:[%s689_s2] ss:$0 sm:$0xff] }
   0x7   :  { %505 = vmatpush3.bf16.msra.mxu0 %v551_v1  ;;  %543 = vmatpush3.bf16.msra.mxu1 %v551_v1  ;;  %v406_v21 = vld [vmem:[%s690_s3] ss:$0 sm:$0xff] }
   0x8   :  { %506 = vmatprep.subr.bf16.mxu0 %v552_v2  ;;  %536 = vmatprep.subr.bf16.mxu1 %v552_v2 }
   0xb   :  { %507 = vmatpush3.bf16.msra.mxu0 %v552_v2  ;;  %544 = vmatpush3.bf16.msra.mxu1 %v552_v2 }
   0xc   :  { %508 = vmatprep.subr.bf16.mxu0 %v553_v3  ;;  %537 = vmatprep.subr.bf16.mxu1 %v553_v3 }
   0xf   :  { %509 = vmatpush3.bf16.msra.mxu0 %v553_v3  ;;  %545 = vmatpush3.bf16.msra.mxu1 %v553_v3 }
  0x10   :  { %510 = vmatprep.subr.bf16.mxu0 %v554_v6  ;;  %538 = vmatprep.subr.bf16.mxu1 %v554_v6 }
  0x13   :  { %511 = vmatpush3.bf16.msra.mxu0 %v554_v6  ;;  %546 = vmatpush3.bf16.msra.mxu1 %v554_v6 }
  0x14   :  { %512 = vmatprep.subr.bf16.mxu0 %v555_v7  ;;  %539 = vmatprep.subr.bf16.mxu1 %v555_v7 }
  0x17   :  { %513 = vmatpush3.bf16.msra.mxu0 %v555_v7  ;;  %547 = vmatpush3.bf16.msra.mxu1 %v555_v7 }
  0x18   :  { %514 = vmatprep.subr.bf16.mxu0 %v556_v8  ;;  %540 = vmatprep.subr.bf16.mxu1 %v556_v8 }
  0x1b   :  { %515 = vmatpush3.bf16.msra.mxu0 %v556_v8  ;;  %548 = vmatpush3.bf16.msra.mxu1 %v556_v8 }
  0x1c   :  { %516 = vmatprep.subr.bf16.mxu0 %v557_v9  ;;  %541 = vmatprep.subr.bf16.mxu1 %v557_v9 }
  0x1f   :  { %517 = vmatpush3.bf16.msra.mxu0 %v557_v9  ;;  %549 = vmatpush3.bf16.msra.mxu1 %v557_v9 }
  0x22   :  { %519 = vmatmul.mubr.bf16.vlgmr.msra.gmra.mxu0 %v560_v10  ;;  %527 = vmatmul.mubr.bf16.vlgmr.msra.gmra.mxu1 %v561_v11 }
  0x23   :  { %522 = vmatprep.mubr.bf16.mxu0 %v562_v12  ;;  %530 = vmatprep.mubr.bf16.mxu1 %v563_v13 }
  0x2a   :  { %523 = vmatmul.mubr.bf16.gmra.mxu0 %v564_v14  ;;  %531 = vmatmul.mubr.bf16.gmra.mxu1 %v565_v15 }
  0xe2   :  { %v520_v17 = vpop.f32.mrf.mxu0  ;;  %v528_v18 = vpop.f32.mrf.mxu1 }
  0xe3   :  { %v252_v19 = vmul.f32 %v520_v17, %v642_v16  ;;  %v260_v20 = vmul.f32 %v528_v18, %v642_v16 }
  0xe4   :  { %v180_v22 = vpop.f32.mrf.mxu0  ;;  %v212_v23 = vpop.f32.mrf.mxu1 }
  0xe5   :  { %v250_v24 = vmul.f32 %v642_v16, %v180_v22  ;;  %v258_v25 = vmul.f32 %v642_v16, %v212_v23  ;;  %v275_v28 = vadd.f32 %v406_v21, %v252_v19  ;;  %v283_v29 = vadd.f32 %v406_v21, %v260_v20 }
  0xe6   :  { %v521_v26 = vpop.f32.mrf.mxu0  ;;  %v529_v27 = vpop.f32.mrf.mxu1 }
  0xe7   :  { %v253_v30 = vmul.f32 %v521_v26, %v642_v16  ;;  %v261_v31 = vmul.f32 %v529_v27, %v642_v16  ;;  %v273_v34 = vadd.f32 %v406_v21, %v250_v24  ;;  %v281_v35 = vadd.f32 %v406_v21, %v258_v25 }
  0xe8   :  { %v183_v32 = vpop.f32.mrf.mxu0  ;;  %v215_v33 = vpop.f32.mrf.mxu1  ;;  %v291_v42 = vmax.f32 %v275_v28, 0.0  ;;  %v299_v43 = vmax.f32 %v283_v29, 0.0 }
  0xe9   :  { %v251_v36 = vmul.f32 %v642_v16, %v183_v32  ;;  %v259_v37 = vmul.f32 %v642_v16, %v215_v33  ;;  %v276_v38 = vadd.f32 %v406_v21, %v253_v30  ;;  %v284_v39 = vadd.f32 %v406_v21, %v261_v31 }
  0xea   :  { %v524_v40 = vpop.f32.mrf.mxu0  ;;  %v532_v41 = vpop.f32.mrf.mxu1  ;;  %v289_v52 = vmax.f32 %v273_v34, 0.0  ;;  %v297_v53 = vmax.f32 %v281_v35, 0.0 }
  0xeb   :  { %v274_v44 = vadd.f32 %v406_v21, %v251_v36  ;;  %v282_v45 = vadd.f32 %v406_v21, %v259_v37  ;;  %v292_v46 = vmax.f32 %v276_v38, 0.0  ;;  %v300_v47 = vmax.f32 %v284_v39, 0.0 }
  0xec   :  { %v256_v48 = vmul.f32 %v524_v40, %v642_v16  ;;  %v264_v49 = vmul.f32 %v532_v41, %v642_v16  ;;  %v196_v50 = vpop.f32.mrf.mxu0  ;;  %v228_v51 = vpop.f32.mrf.mxu1 }
  0xed   :  { %v290_v54 = vmax.f32 %v274_v44, 0.0  ;;  %v298_v55 = vmax.f32 %v282_v45, 0.0  ;;  %v447_v56 = vpack.c.bf16 %v292_v46, %v291_v42  ;;  %v467_v57 = vpack.c.bf16 %v300_v47, %v299_v43 }
  0xee   :  { %v254_v58 = vmul.f32 %v642_v16, %v196_v50  ;;  %v262_v59 = vmul.f32 %v642_v16, %v228_v51  ;;  %v525_v60 = vpop.f32.mrf.mxu0  ;;  %v533_v61 = vpop.f32.mrf.mxu1  ;;  %v279_v0 = vadd.f32 %v406_v21, %v256_v48  ;;  %v287_v1 = vadd.f32 %v406_v21, %v264_v49 }
  0xef   :  { %v442_v62 = vpack.c.bf16 %v290_v54, %v289_v52  ;;  %v462_v63 = vpack.c.bf16 %v298_v55, %v297_v53  ;;  %479 = vst [vmem:[%s691_s4 + $0x8] sm:$0xff] %v447_v56   ;;  %483 = vst [vmem:[%s691_s4 + $0x28] sm:$0xff] %v467_v57   ;;  %v257_v2 = vmul.f32 %v525_v60, %v642_v16 }
  0xf0   :  { %v265_v3 = vmul.f32 %v533_v61, %v642_v16  ;;  %v199_v4 = vpop.f32.mrf.mxu0  ;;  %v231_v5 = vpop.f32.mrf.mxu1  ;;  %v277_v6 = vadd.f32 %v406_v21, %v254_v58  ;;  %v285_v7 = vadd.f32 %v406_v21, %v262_v59  ;;  %v295_v14 = vmax.f32 %v279_v0, 0.0 }
  0xf1   :  { %443 = vst [vmem:[%s691_s4] sm:$0xff] %v442_v62   ;;  %482 = vst [vmem:[%s691_s4 + $0x20] sm:$0xff] %v462_v63   ;;  %v255_v8 = vmul.f32 %v642_v16, %v199_v4  ;;  %v263_v9 = vmul.f32 %v642_v16, %v231_v5  ;;  %v280_v10 = vadd.f32 %v406_v21, %v257_v2  ;;  %v303_v15 = vmax.f32 %v287_v1, 0.0 }
  0xf2   :  { %v288_v11 = vadd.f32 %v406_v21, %v265_v3  ;;  %v293_v19 = vmax.f32 %v277_v6, 0.0  ;;  %v301_v20 = vmax.f32 %v285_v7, 0.0 }
  0xf3   :  { %v278_v12 = vadd.f32 %v406_v21, %v255_v8  ;;  %v286_v13 = vadd.f32 %v406_v21, %v263_v9  ;;  %v296_v17 = vmax.f32 %v280_v10, 0.0 }
  0xf4   :  { %v304_v18 = vmax.f32 %v288_v11, 0.0 }
  0xf5   :  { %v294_v22 = vmax.f32 %v278_v12, 0.0  ;;  %v302_v23 = vmax.f32 %v286_v13, 0.0  ;;  %v457_v24 = vpack.c.bf16 %v296_v17, %v295_v14 }
  0xf6   :  { %v477_v25 = vpack.c.bf16 %v304_v18, %v303_v15 }
  0xf7   :  { %v452_v26 = vpack.c.bf16 %v294_v22, %v293_v19  ;;  %v472_v27 = vpack.c.bf16 %v302_v23, %v301_v20  ;;  %481 = vst [vmem:[%s691_s4 + $0x18] sm:$0xff] %v457_v24  }
  0xf8   :  { %485 = vst [vmem:[%s691_s4 + $0x38] sm:$0xff] %v477_v25  }
  0xf9   :  { %480 = vst [vmem:[%s691_s4 + $0x10] sm:$0xff] %v452_v26   ;;  %484 = vst [vmem:[%s691_s4 + $0x30] sm:$0xff] %v472_v27  }

// kernel: downsample_forward.3
= control target key start
LH: loop header
LB: loop body
LE: loop exit
PB: predicated region body
PF: predicated region fallthrough
CT: control target
= control target key end

     0   :  { %s586_s1 = inlined_call_operand.vmem [shape: bf16[128,128], index: 1, kind: input, shape index: {}]   ;;  %s587_s0 = inlined_call_operand.vmem [shape: bf16[128,128], index: 0, kind: input, shape index: {}]   ;;  %s588_s2 = inlined_call_operand.vmem [shape: f32[1,128], index: 2, kind: input, shape index: {}]   ;;  %s589_s3 = inlined_call_operand.vmem [shape: f32[1,128], index: 3, kind: input, shape index: {}]   ;;  %s590_s4 = inlined_call_operand.vmem [shape: f32[128,128], index: 4, kind: output, shape index: {}]  }
   0x1   :  { %v407_v0 = vld [vmem:[%s586_s1 + $0x38] sm:$0xff]   ;;  %v408_v1 = vld [vmem:[%s586_s1 + $0x30] sm:$0xff]   ;;  %v409_v2 = vld [vmem:[%s586_s1 + $0x28] sm:$0xff]  }
   0x2   :  { %359 = vmatprep.subr.bf16.mxu0 %v407_v0  ;;  %391 = vmatprep.subr.bf16.mxu1 %v407_v0  ;;  %v410_v3 = vld [vmem:[%s586_s1 + $0x20] sm:$0xff]   ;;  %v411_v6 = vld [vmem:[%s586_s1 + $0x18] sm:$0xff]   ;;  %v412_v7 = vld [vmem:[%s586_s1 + $0x10] sm:$0xff]  }
   0x3   :  { %360 = vmatpush3.bf16.msra.mxu0 %v407_v0  ;;  %399 = vmatpush3.bf16.msra.mxu1 %v407_v0  ;;  %v415_v4 = vld [vmem:[%s587_s0] sm:$0xff]   ;;  %v413_v8 = vld [vmem:[%s586_s1 + $0x8] sm:$0xff]   ;;  %v419_v12 = vld [vmem:[%s587_s0 + $0x10] sm:$0xff]  }
   0x4   :  { %361 = vmatprep.subr.bf16.mxu0 %v408_v1  ;;  %392 = vmatprep.subr.bf16.mxu1 %v408_v1  ;;  %v416_v5 = vld [vmem:[%s587_s0 + $0x20] sm:$0xff]   ;;  %v417_v10 = vld [vmem:[%s587_s0 + $0x8] sm:$0xff]   ;;  %v420_v13 = vld [vmem:[%s587_s0 + $0x30] sm:$0xff]  }
   0x5   :  { %375 = vmatprep.mubr.bf16.mxu0 %v415_v4  ;;  %383 = vmatprep.mubr.bf16.mxu1 %v416_v5  ;;  %v414_v9 = vld [vmem:[%s586_s1] sm:$0xff]   ;;  %v418_v11 = vld [vmem:[%s587_s0 + $0x28] sm:$0xff]   ;;  %v421_v14 = vld [vmem:[%s587_s0 + $0x18] sm:$0xff]  }
   0x6   :  { %v422_v15 = vld [vmem:[%s587_s0 + $0x38] sm:$0xff]   ;;  %v499_v16 = vld [vmem:[%s588_s2] ss:$0 sm:$0xff] }
   0x7   :  { %362 = vmatpush3.bf16.msra.mxu0 %v408_v1  ;;  %400 = vmatpush3.bf16.msra.mxu1 %v408_v1  ;;  %v504_v18 = vld [vmem:[%s589_s3] ss:$0 sm:$0xff] }
   0x8   :  { %363 = vmatprep.subr.bf16.mxu0 %v409_v2  ;;  %393 = vmatprep.subr.bf16.mxu1 %v409_v2 }
   0xb   :  { %364 = vmatpush3.bf16.msra.mxu0 %v409_v2  ;;  %401 = vmatpush3.bf16.msra.mxu1 %v409_v2 }
   0xc   :  { %365 = vmatprep.subr.bf16.mxu0 %v410_v3  ;;  %394 = vmatprep.subr.bf16.mxu1 %v410_v3 }
   0xf   :  { %366 = vmatpush3.bf16.msra.mxu0 %v410_v3  ;;  %402 = vmatpush3.bf16.msra.mxu1 %v410_v3 }
  0x10   :  { %367 = vmatprep.subr.bf16.mxu0 %v411_v6  ;;  %395 = vmatprep.subr.bf16.mxu1 %v411_v6 }
  0x13   :  { %368 = vmatpush3.bf16.msra.mxu0 %v411_v6  ;;  %403 = vmatpush3.bf16.msra.mxu1 %v411_v6 }
  0x14   :  { %369 = vmatprep.subr.bf16.mxu0 %v412_v7  ;;  %396 = vmatprep.subr.bf16.mxu1 %v412_v7 }
  0x17   :  { %370 = vmatpush3.bf16.msra.mxu0 %v412_v7  ;;  %404 = vmatpush3.bf16.msra.mxu1 %v412_v7 }
  0x18   :  { %371 = vmatprep.subr.bf16.mxu0 %v413_v8  ;;  %397 = vmatprep.subr.bf16.mxu1 %v413_v8 }
  0x1b   :  { %372 = vmatpush3.bf16.msra.mxu0 %v413_v8  ;;  %405 = vmatpush3.bf16.msra.mxu1 %v413_v8 }
  0x1c   :  { %373 = vmatprep.subr.bf16.mxu0 %v414_v9  ;;  %398 = vmatprep.subr.bf16.mxu1 %v414_v9 }
  0x1f   :  { %374 = vmatpush3.bf16.msra.mxu0 %v414_v9  ;;  %406 = vmatpush3.bf16.msra.mxu1 %v414_v9 }
  0x22   :  { %376 = vmatmul.mubr.bf16.vlgmr.msra.gmra.mxu0 %v417_v10  ;;  %384 = vmatmul.mubr.bf16.vlgmr.msra.gmra.mxu1 %v418_v11 }
  0x23   :  { %379 = vmatprep.mubr.bf16.mxu0 %v419_v12  ;;  %387 = vmatprep.mubr.bf16.mxu1 %v420_v13 }
  0x2a   :  { %380 = vmatmul.mubr.bf16.gmra.mxu0 %v421_v14  ;;  %388 = vmatmul.mubr.bf16.gmra.mxu1 %v422_v15 }
  0xe2   :  { %v377_v17 = vpop.f32.mrf.mxu0  ;;  %v385_v19 = vpop.f32.mrf.mxu1 }
  0xe3   :  { %v252_v20 = vmul.f32 %v377_v17, %v499_v16  ;;  %v260_v21 = vmul.f32 %v385_v19, %v499_v16 }
  0xe4   :  { %v180_v22 = vpop.f32.mrf.mxu0  ;;  %v212_v23 = vpop.f32.mrf.mxu1 }
  0xe5   :  { %v275_v24 = vadd.f32 %v504_v18, %v252_v20  ;;  %v283_v25 = vadd.f32 %v504_v18, %v260_v21  ;;  %v250_v26 = vmul.f32 %v499_v16, %v180_v22  ;;  %v258_v27 = vmul.f32 %v499_v16, %v212_v23 }
  0xe6   :  { %v378_v28 = vpop.f32.mrf.mxu0  ;;  %v386_v29 = vpop.f32.mrf.mxu1 }
  0xe7   :  { %v291_v30 = vmax.f32 %v275_v24, 0.0  ;;  %v299_v31 = vmax.f32 %v283_v25, 0.0  ;;  %v273_v32 = vadd.f32 %v504_v18, %v250_v26  ;;  %v281_v33 = vadd.f32 %v504_v18, %v258_v27 }
  0xe8   :  { %v253_v34 = vmul.f32 %v378_v28, %v499_v16  ;;  %v261_v35 = vmul.f32 %v386_v29, %v499_v16  ;;  %v183_v36 = vpop.f32.mrf.mxu0  ;;  %v215_v37 = vpop.f32.mrf.mxu1 }
  0xe9   :  { %307 = vst [vmem:[%s590_s4 + $0x10] sm:$0xff] %v291_v30  ;;  %315 = vst [vmem:[%s590_s4 + $0x50] sm:$0xff] %v299_v31  ;;  %v289_v38 = vmax.f32 %v273_v32, 0.0  ;;  %v297_v39 = vmax.f32 %v281_v33, 0.0  ;;  %v251_v40 = vmul.f32 %v499_v16, %v183_v36  ;;  %v259_v41 = vmul.f32 %v499_v16, %v215_v37 }
  0xea   :  { %v276_v42 = vadd.f32 %v504_v18, %v253_v34  ;;  %v284_v43 = vadd.f32 %v504_v18, %v261_v35  ;;  %v381_v44 = vpop.f32.mrf.mxu0  ;;  %v389_v45 = vpop.f32.mrf.mxu1 }
  0xeb   :  { %305 = vst [vmem:[%s590_s4] sm:$0xff] %v289_v38  ;;  %313 = vst [vmem:[%s590_s4 + $0x40] sm:$0xff] %v297_v39  ;;  %v274_v46 = vadd.f32 %v504_v18, %v251_v40  ;;  %v282_v47 = vadd.f32 %v504_v18, %v259_v41  ;;  %v256_v48 = vmul.f32 %v381_v44, %v499_v16 }
  0xec   :  { %v264_v49 = vmul.f32 %v389_v45, %v499_v16  ;;  %v292_v50 = vmax.f32 %v276_v42, 0.0  ;;  %v300_v51 = vmax.f32 %v284_v43, 0.0  ;;  %v196_v52 = vpop.f32.mrf.mxu0  ;;  %v228_v53 = vpop.f32.mrf.mxu1 }
  0xed   :  { %v290_v54 = vmax.f32 %v274_v46, 0.0  ;;  %v298_v55 = vmax.f32 %v282_v47, 0.0  ;;  %v279_v56 = vadd.f32 %v504_v18, %v256_v48  ;;  %v254_v58 = vmul.f32 %v499_v16, %v196_v52 }
  0xee   :  { %v287_v57 = vadd.f32 %v504_v18, %v264_v49  ;;  %308 = vst [vmem:[%s590_s4 + $0x18] sm:$0xff] %v292_v50  ;;  %316 = vst [vmem:[%s590_s4 + $0x58] sm:$0xff] %v300_v51  ;;  %v262_v59 = vmul.f32 %v499_v16, %v228_v53  ;;  %v382_v60 = vpop.f32.mrf.mxu0  ;;  %v390_v61 = vpop.f32.mrf.mxu1 }
  0xef   :  { %306 = vst [vmem:[%s590_s4 + $0x8] sm:$0xff] %v290_v54  ;;  %314 = vst [vmem:[%s590_s4 + $0x48] sm:$0xff] %v298_v55  ;;  %v295_v62 = vmax.f32 %v279_v56, 0.0  ;;  %v257_v0 = vmul.f32 %v382_v60, %v499_v16  ;;  %v265_v1 = vmul.f32 %v390_v61, %v499_v16  ;;  %v277_v2 = vadd.f32 %v504_v18, %v254_v58 }
  0xf0   :  { %v303_v63 = vmax.f32 %v287_v57, 0.0  ;;  %v285_v3 = vadd.f32 %v504_v18, %v262_v59  ;;  %v199_v4 = vpop.f32.mrf.mxu0  ;;  %v231_v5 = vpop.f32.mrf.mxu1 }
  0xf1   :  { %311 = vst [vmem:[%s590_s4 + $0x30] sm:$0xff] %v295_v62  ;;  %v280_v6 = vadd.f32 %v504_v18, %v257_v0  ;;  %v288_v7 = vadd.f32 %v504_v18, %v265_v1  ;;  %v255_v8 = vmul.f32 %v499_v16, %v199_v4  ;;  %v263_v9 = vmul.f32 %v499_v16, %v231_v5 }
  0xf2   :  { %319 = vst [vmem:[%s590_s4 + $0x70] sm:$0xff] %v303_v63  ;;  %v293_v10 = vmax.f32 %v277_v2, 0.0  ;;  %v301_v11 = vmax.f32 %v285_v3, 0.0 }
  0xf3   :  { %v296_v12 = vmax.f32 %v280_v6, 0.0  ;;  %v304_v13 = vmax.f32 %v288_v7, 0.0  ;;  %v278_v14 = vadd.f32 %v504_v18, %v255_v8  ;;  %v286_v15 = vadd.f32 %v504_v18, %v263_v9 }
  0xf4   :  { %309 = vst [vmem:[%s590_s4 + $0x20] sm:$0xff] %v293_v10  ;;  %317 = vst [vmem:[%s590_s4 + $0x60] sm:$0xff] %v301_v11 }
  0xf5   :  { %312 = vst [vmem:[%s590_s4 + $0x38] sm:$0xff] %v296_v12  ;;  %320 = vst [vmem:[%s590_s4 + $0x78] sm:$0xff] %v304_v13  ;;  %v294_v16 = vmax.f32 %v278_v14, 0.0  ;;  %v302_v17 = vmax.f32 %v286_v15, 0.0 }
  0xf7   :  { %310 = vst [vmem:[%s590_s4 + $0x28] sm:$0xff] %v294_v16  ;;  %318 = vst [vmem:[%s590_s4 + $0x68] sm:$0xff] %v302_v17 }

</bundles_post_ra>
